<compile_context>
chip_gen: v7x
topology: tpu7x:2x2x1
jax: 0.10.0
libtpu: 0.0.40
codegen_flags: <defaults>
</compile_context>

<pallas_src>
import functools

import jax
import jax.numpy as jnp
from jax.experimental import pallas as pl
from jax.experimental.pallas import tpu as pltpu


# ----------------------------- Pallas kernel ------------------------------ #
def processor_kernel(edges_ref, z_ref, params_ref, o_ref, *,
                     n_nodes, d_hidden, n_mp):
    N, D = n_nodes, d_hidden
    E = edges_ref.shape[1]

    # ---- Build the dense weighted adjacency A[dst, src] on the MXU -------- #
    edges = edges_ref[...]                               # (3, E) f32
    src = edges[0:1, :].astype(jnp.int32)                # (1, E)
    dst = edges[1:2, :].astype(jnp.int32)                # (1, E)
    w = edges[2:3, :]                                    # (1, E)

    node_ids = jax.lax.broadcasted_iota(jnp.int32, (N, E), 0)      # (N, E)
    m_dst = (node_ids == dst).astype(jnp.float32)                  # (N, E)
    m_src_w = jnp.where(node_ids == src, w, 0.0)                   # (N, E)
    # A[d, s] = sum_e [dst_e == d] * w_e * [src_e == s]
    a = jnp.dot(m_dst, m_src_w.T, preferred_element_type=jnp.float32)  # (N, N)

    x = z_ref[...]                                       # (N, D)

    # ---- One GBlock (Identity norm, ReLU, optional residual) -------------- #
    def gblock(x, w_rel, w_root, b_full, skip):
        agg = jnp.dot(a, x, preferred_element_type=jnp.float32)            # (N, D)
        out = (jnp.dot(agg, w_rel, preferred_element_type=jnp.float32)
               + jnp.dot(x, w_root, preferred_element_type=jnp.float32)
               + b_full)
        out = jnp.maximum(out, 0.0)
        if skip:                                        # skip-connection block
            out = jnp.maximum(out + x, 0.0)
        return out

    # Static-index slab loads from the packed (3, 2D+1, D) parameter tensor.
    def layer_params(li):
        w_rel = params_ref[li, 0:D, :]                   # (D, D)
        w_root = params_ref[li, D:2 * D, :]              # (D, D)
        # Bias broadcast hoisted here (once per unique block).
        b_full = jnp.broadcast_to(params_ref[li, 2 * D:2 * D + 1, :], (N, D))
        return w_rel, w_root, b_full

    # Layer 0: GBlock(d_in -> d_hidden), no skip connection.
    wf_rel, wf_root, bf = layer_params(0)
    x = gblock(x, wf_rel, wf_root, bf, skip=False)

    # Middle layers: identical (deepcopied) blocks -> weights loaded once.
    wm_rel, wm_root, bm = layer_params(1)
    for _ in range(n_mp - 2):                            # static trip count
        x = gblock(x, wm_rel, wm_root, bm, skip=True)

    # Last layer: no skip connection.
    wl_rel, wl_root, bl = layer_params(2)
    x = gblock(x, wl_rel, wl_root, bl, skip=False)

    # Dropout(p=0.0) == identity. Single (final) store of the output.
    o_ref[...] = x.astype(o_ref.dtype)


def make_processor_call(n_nodes, d_hidden, n_mp):
    vmem = pl.BlockSpec(memory_space=pltpu.MemorySpace.VMEM)
    return pl.pallas_call(
        functools.partial(processor_kernel,
                          n_nodes=n_nodes, d_hidden=d_hidden, n_mp=n_mp),
        out_shape=jax.ShapeDtypeStruct((n_nodes, d_hidden), jnp.float32),
        in_specs=[vmem, vmem, vmem],      # edges, z, packed params
        out_specs=vmem,
    )


# ------------------------------ JAX glue ----------------------------------- #
@functools.partial(jax.jit, static_argnames=("n_mp",))
def processor_forward(z, edge_index, edge_weight, params, *, n_mp):
    n_nodes, d_hidden = z.shape
    # Pack [src; dst; w] into a single (3, E) f32 input (indices exact in f32).
    edges = jnp.concatenate(
        [edge_index.astype(jnp.float32), edge_weight.reshape(1, -1)], axis=0)
    call = make_processor_call(n_nodes, d_hidden, n_mp)
    return call(edges, z, params)


def init_gblock_params(key, d_in, d_out):
    """W_rel, W_root, b (PyTorch Linear init style), stored as (D_in, D_out)."""
    k1, k2, k3 = jax.random.split(key, 3)
    s = 1.0 / jnp.sqrt(d_in)
    w_rel = jax.random.uniform(k1, (d_in, d_out), jnp.float32, -s, s)
    w_root = jax.random.uniform(k2, (d_in, d_out), jnp.float32, -s, s)
    b_rel = jax.random.uniform(k3, (1, d_out), jnp.float32, -s, s)
    return w_rel, w_root, b_rel


def pack_params(first, mid, last):
    """Pack the 3 unique blocks into one (3, 2D+1, D) tensor: [W_rel; W_root; b].

    Middle-block dedup is valid because the n_mp-2 clones are deepcopies at
    init; for trained/distinct middle blocks use an (n_mp, 2D+1, D) stack and
    index per layer instead.
    """
    def pack_one(p):
        w_rel, w_root, b = p
        return jnp.concatenate([w_rel, w_root, b], axis=0)
    return jnp.stack([pack_one(first), pack_one(mid), pack_one(last)], axis=0)


def processor_reference(z, edge_index, edge_weight, layer_params):
    """Pure-JAX reference (scatter adjacency, un-fused) for correctness check."""
    n_nodes = z.shape[0]
    src, dst = edge_index[0], edge_index[1]
    a = jnp.zeros((n_nodes, n_nodes), jnp.float32).at[dst, src].add(edge_weight)
    for (w_rel, w_root, b_rel), skip in layer_params:
        out = (a @ z) @ w_rel + b_rel + z @ w_root
        out = jnp.maximum(out, 0.0)
        if skip:
            out = jnp.maximum(out + z, 0.0)
        z = out
    return z


# --------------------------------- main ------------------------------------ #
if __name__ == "__main__":
    N_NODES = 16
    N_EDGES = 48
    D_IN = 32          # fixed by Processor: first GBlock is GBlock(32, d_hidden, ...)
    D_HIDDEN = 32
    N_MP = 4

    assert N_MP >= 2
    assert D_IN == D_HIDDEN, "skip-connection blocks require d_in == d_hidden"

    key = jax.random.PRNGKey(0)
    k_z, k_src, k_dst, k_w, k_f, k_m, k_l = jax.random.split(key, 7)

    z = jax.random.normal(k_z, (N_NODES, D_IN), jnp.float32)
    edge_index = jnp.stack([
        jax.random.randint(k_src, (N_EDGES,), 0, N_NODES),
        jax.random.randint(k_dst, (N_EDGES,), 0, N_NODES),
    ])                                                  # (2, E)
    edge_weight = jax.random.uniform(k_w, (N_EDGES,), jnp.float32)
    batch = jnp.zeros((N_NODES,), jnp.int32)            # unused (Identity norm)

    # Unique parameter sets: first block, one shared middle block (clones are
    # deepcopies with identical values), last block.
    first = init_gblock_params(k_f, D_IN, D_HIDDEN)
    mid = init_gblock_params(k_m, D_HIDDEN, D_HIDDEN)
    last = init_gblock_params(k_l, D_HIDDEN, D_HIDDEN)
    params = pack_params(first, mid, last)              # (3, 2D+1, D)

    out = processor_forward(z, edge_index, edge_weight, params, n_mp=N_MP)
    out = jax.block_until_ready(out)

    layer_params = ([(first, False)]
                    + [(mid, True)] * (N_MP - 2)
                    + [(last, False)])
    ref = processor_reference(z, edge_index, edge_weight, layer_params)

    assert out.shape == (N_NODES, D_HIDDEN)
    assert jnp.allclose(out, ref, atol=1e-4, rtol=1e-4), "mismatch vs reference"

    print("KERNEL_OK")
</pallas_src>

<mosaic_0001>
module attributes {stable_mosaic.version = 11 : i64} {
  func.func @processor_kernel(%arg0: memref<3x48xf32, #tpu.memory_space<vmem>>, %arg1: memref<16x32xf32, #tpu.memory_space<vmem>>, %arg2: memref<3x65x32xf32, #tpu.memory_space<vmem>>, %arg3: memref<16x32xf32, #tpu.memory_space<vmem>>) attributes {dimension_semantics = [], scalar_prefetch = 0 : i64, scratch_operands = 0 : i64, tpu.core_type = #tpu.core_type<tc>} {
    %c0 = arith.constant 0 : index
    %c0_0 = arith.constant 0 : index
    %0 = vector.load %arg0[%c0, %c0_0] : memref<3x48xf32, #tpu.memory_space<vmem>>, vector<3x48xf32>
    %1 = vector.extract_strided_slice %0 {offsets = [0, 0], sizes = [1, 48], strides = [1, 1]} : vector<3x48xf32> to vector<1x48xf32>
    %2 = arith.fptosi %1 : vector<1x48xf32> to vector<1x48xi32>
    %3 = vector.extract_strided_slice %0 {offsets = [1, 0], sizes = [1, 48], strides = [1, 1]} : vector<3x48xf32> to vector<1x48xf32>
    %4 = arith.fptosi %3 : vector<1x48xf32> to vector<1x48xi32>
    %5 = vector.extract_strided_slice %0 {offsets = [2, 0], sizes = [1, 48], strides = [1, 1]} : vector<3x48xf32> to vector<1x48xf32>
    %6 = tpu.iota {dimensions = array<i32: 0>} : vector<16x48xi32>
    %7 = vector.broadcast %4 : vector<1x48xi32> to vector<16x48xi32>
    %8 = arith.cmpi eq, %6, %7 : vector<16x48xi32>
    %9 = arith.extui %8 : vector<16x48xi1> to vector<16x48xi32>
    %10 = arith.sitofp %9 : vector<16x48xi32> to vector<16x48xf32>
    %11 = vector.broadcast %2 : vector<1x48xi32> to vector<16x48xi32>
    %12 = arith.cmpi eq, %6, %11 : vector<16x48xi32>
    %cst = arith.constant 0.000000e+00 : f32
    %13 = vector.shape_cast %5 : vector<1x48xf32> to vector<1x48xf32>
    %14 = vector.broadcast %13 : vector<1x48xf32> to vector<16x48xf32>
    %15 = vector.broadcast %cst : f32 to vector<16x48xf32>
    %16 = arith.select %12, %14, %15 : vector<16x48xi1>, vector<16x48xf32>
    %17 = tpu.transpose %16, [1, 0] : vector<16x48xf32> -> vector<48x16xf32>
    %cst_1 = arith.constant dense<0.000000e+00> : vector<16x16xf32>
    %18 = tpu.matmul %10, %17, %cst_1 {dimension_numbers = #tpu.dot_dimension_numbers<[1], [0], [0], [1], [0, 0, 1, 1], [], []>} : vector<16x48xf32>, vector<48x16xf32>, vector<16x16xf32> -> vector<16x16xf32>
    %c0_2 = arith.constant 0 : index
    %c0_3 = arith.constant 0 : index
    %19 = vector.load %arg1[%c0_2, %c0_3] : memref<16x32xf32, #tpu.memory_space<vmem>>, vector<16x32xf32>
    %c0_4 = arith.constant 0 : index
    %c0_5 = arith.constant 0 : index
    %c0_6 = arith.constant 0 : index
    %20 = vector.load %arg2[%c0_4, %c0_5, %c0_6] : memref<3x65x32xf32, #tpu.memory_space<vmem>>, vector<1x32x32xf32>
    %21 = vector.shape_cast %20 : vector<1x32x32xf32> to vector<32x32xf32>
    %c0_7 = arith.constant 0 : index
    %c32 = arith.constant 32 : index
    %c0_8 = arith.constant 0 : index
    %22 = vector.load %arg2[%c0_7, %c32, %c0_8] : memref<3x65x32xf32, #tpu.memory_space<vmem>>, vector<1x32x32xf32>
    %23 = vector.shape_cast %22 : vector<1x32x32xf32> to vector<32x32xf32>
    %c0_9 = arith.constant 0 : index
    %c64 = arith.constant 64 : index
    %c0_10 = arith.constant 0 : index
    %24 = vector.load %arg2[%c0_9, %c64, %c0_10] : memref<3x65x32xf32, #tpu.memory_space<vmem>>, vector<1x1x32xf32>
    %25 = vector.shape_cast %24 : vector<1x1x32xf32> to vector<1x32xf32>
    %26 = vector.shape_cast %25 : vector<1x32xf32> to vector<1x32xf32>
    %27 = vector.broadcast %26 : vector<1x32xf32> to vector<16x32xf32>
    %cst_11 = arith.constant dense<0.000000e+00> : vector<16x32xf32>
    %28 = tpu.matmul %18, %19, %cst_11 {dimension_numbers = #tpu.dot_dimension_numbers<[1], [0], [0], [1], [0, 0, 1, 1], [], []>} : vector<16x16xf32>, vector<16x32xf32>, vector<16x32xf32> -> vector<16x32xf32>
    %cst_12 = arith.constant dense<0.000000e+00> : vector<16x32xf32>
    %29 = tpu.matmul %28, %21, %cst_12 {dimension_numbers = #tpu.dot_dimension_numbers<[1], [0], [0], [1], [0, 0, 1, 1], [], []>} : vector<16x32xf32>, vector<32x32xf32>, vector<16x32xf32> -> vector<16x32xf32>
    %cst_13 = arith.constant dense<0.000000e+00> : vector<16x32xf32>
    %30 = tpu.matmul %19, %23, %cst_13 {dimension_numbers = #tpu.dot_dimension_numbers<[1], [0], [0], [1], [0, 0, 1, 1], [], []>} : vector<16x32xf32>, vector<32x32xf32>, vector<16x32xf32> -> vector<16x32xf32>
    %31 = arith.addf %29, %30 : vector<16x32xf32>
    %32 = arith.addf %31, %27 : vector<16x32xf32>
    %cst_14 = arith.constant 0.000000e+00 : f32
    %33 = vector.broadcast %cst_14 : f32 to vector<16x32xf32>
    %34 = arith.maximumf %32, %33 : vector<16x32xf32>
    %c1 = arith.constant 1 : index
    %c0_15 = arith.constant 0 : index
    %c0_16 = arith.constant 0 : index
    %35 = vector.load %arg2[%c1, %c0_15, %c0_16] : memref<3x65x32xf32, #tpu.memory_space<vmem>>, vector<1x32x32xf32>
    %36 = vector.shape_cast %35 : vector<1x32x32xf32> to vector<32x32xf32>
    %c1_17 = arith.constant 1 : index
    %c32_18 = arith.constant 32 : index
    %c0_19 = arith.constant 0 : index
    %37 = vector.load %arg2[%c1_17, %c32_18, %c0_19] : memref<3x65x32xf32, #tpu.memory_space<vmem>>, vector<1x32x32xf32>
    %38 = vector.shape_cast %37 : vector<1x32x32xf32> to vector<32x32xf32>
    %c1_20 = arith.constant 1 : index
    %c64_21 = arith.constant 64 : index
    %c0_22 = arith.constant 0 : index
    %39 = vector.load %arg2[%c1_20, %c64_21, %c0_22] : memref<3x65x32xf32, #tpu.memory_space<vmem>>, vector<1x1x32xf32>
    %40 = vector.shape_cast %39 : vector<1x1x32xf32> to vector<1x32xf32>
    %41 = vector.shape_cast %40 : vector<1x32xf32> to vector<1x32xf32>
    %42 = vector.broadcast %41 : vector<1x32xf32> to vector<16x32xf32>
    %cst_23 = arith.constant dense<0.000000e+00> : vector<16x32xf32>
    %43 = tpu.matmul %18, %34, %cst_23 {dimension_numbers = #tpu.dot_dimension_numbers<[1], [0], [0], [1], [0, 0, 1, 1], [], []>} : vector<16x16xf32>, vector<16x32xf32>, vector<16x32xf32> -> vector<16x32xf32>
    %cst_24 = arith.constant dense<0.000000e+00> : vector<16x32xf32>
    %44 = tpu.matmul %43, %36, %cst_24 {dimension_numbers = #tpu.dot_dimension_numbers<[1], [0], [0], [1], [0, 0, 1, 1], [], []>} : vector<16x32xf32>, vector<32x32xf32>, vector<16x32xf32> -> vector<16x32xf32>
    %cst_25 = arith.constant dense<0.000000e+00> : vector<16x32xf32>
    %45 = tpu.matmul %34, %38, %cst_25 {dimension_numbers = #tpu.dot_dimension_numbers<[1], [0], [0], [1], [0, 0, 1, 1], [], []>} : vector<16x32xf32>, vector<32x32xf32>, vector<16x32xf32> -> vector<16x32xf32>
    %46 = arith.addf %44, %45 : vector<16x32xf32>
    %47 = arith.addf %46, %42 : vector<16x32xf32>
    %cst_26 = arith.constant 0.000000e+00 : f32
    %48 = vector.broadcast %cst_26 : f32 to vector<16x32xf32>
    %49 = arith.maximumf %47, %48 : vector<16x32xf32>
    %50 = arith.addf %49, %34 : vector<16x32xf32>
    %cst_27 = arith.constant 0.000000e+00 : f32
    %51 = vector.broadcast %cst_27 : f32 to vector<16x32xf32>
    %52 = arith.maximumf %50, %51 : vector<16x32xf32>
    %cst_28 = arith.constant dense<0.000000e+00> : vector<16x32xf32>
    %53 = tpu.matmul %18, %52, %cst_28 {dimension_numbers = #tpu.dot_dimension_numbers<[1], [0], [0], [1], [0, 0, 1, 1], [], []>} : vector<16x16xf32>, vector<16x32xf32>, vector<16x32xf32> -> vector<16x32xf32>
    %cst_29 = arith.constant dense<0.000000e+00> : vector<16x32xf32>
    %54 = tpu.matmul %53, %36, %cst_29 {dimension_numbers = #tpu.dot_dimension_numbers<[1], [0], [0], [1], [0, 0, 1, 1], [], []>} : vector<16x32xf32>, vector<32x32xf32>, vector<16x32xf32> -> vector<16x32xf32>
    %cst_30 = arith.constant dense<0.000000e+00> : vector<16x32xf32>
    %55 = tpu.matmul %52, %38, %cst_30 {dimension_numbers = #tpu.dot_dimension_numbers<[1], [0], [0], [1], [0, 0, 1, 1], [], []>} : vector<16x32xf32>, vector<32x32xf32>, vector<16x32xf32> -> vector<16x32xf32>
    %56 = arith.addf %54, %55 : vector<16x32xf32>
    %57 = arith.addf %56, %42 : vector<16x32xf32>
    %cst_31 = arith.constant 0.000000e+00 : f32
    %58 = vector.broadcast %cst_31 : f32 to vector<16x32xf32>
    %59 = arith.maximumf %57, %58 : vector<16x32xf32>
    %60 = arith.addf %59, %52 : vector<16x32xf32>
    %cst_32 = arith.constant 0.000000e+00 : f32
    %61 = vector.broadcast %cst_32 : f32 to vector<16x32xf32>
    %62 = arith.maximumf %60, %61 : vector<16x32xf32>
    %c2 = arith.constant 2 : index
    %c0_33 = arith.constant 0 : index
    %c0_34 = arith.constant 0 : index
    %63 = vector.load %arg2[%c2, %c0_33, %c0_34] : memref<3x65x32xf32, #tpu.memory_space<vmem>>, vector<1x32x32xf32>
    %64 = vector.shape_cast %63 : vector<1x32x32xf32> to vector<32x32xf32>
    %c2_35 = arith.constant 2 : index
    %c32_36 = arith.constant 32 : index
    %c0_37 = arith.constant 0 : index
    %65 = vector.load %arg2[%c2_35, %c32_36, %c0_37] : memref<3x65x32xf32, #tpu.memory_space<vmem>>, vector<1x32x32xf32>
    %66 = vector.shape_cast %65 : vector<1x32x32xf32> to vector<32x32xf32>
    %c2_38 = arith.constant 2 : index
    %c64_39 = arith.constant 64 : index
    %c0_40 = arith.constant 0 : index
    %67 = vector.load %arg2[%c2_38, %c64_39, %c0_40] : memref<3x65x32xf32, #tpu.memory_space<vmem>>, vector<1x1x32xf32>
    %68 = vector.shape_cast %67 : vector<1x1x32xf32> to vector<1x32xf32>
    %69 = vector.shape_cast %68 : vector<1x32xf32> to vector<1x32xf32>
    %70 = vector.broadcast %69 : vector<1x32xf32> to vector<16x32xf32>
    %cst_41 = arith.constant dense<0.000000e+00> : vector<16x32xf32>
    %71 = tpu.matmul %18, %62, %cst_41 {dimension_numbers = #tpu.dot_dimension_numbers<[1], [0], [0], [1], [0, 0, 1, 1], [], []>} : vector<16x16xf32>, vector<16x32xf32>, vector<16x32xf32> -> vector<16x32xf32>
    %cst_42 = arith.constant dense<0.000000e+00> : vector<16x32xf32>
    %72 = tpu.matmul %71, %64, %cst_42 {dimension_numbers = #tpu.dot_dimension_numbers<[1], [0], [0], [1], [0, 0, 1, 1], [], []>} : vector<16x32xf32>, vector<32x32xf32>, vector<16x32xf32> -> vector<16x32xf32>
    %cst_43 = arith.constant dense<0.000000e+00> : vector<16x32xf32>
    %73 = tpu.matmul %62, %66, %cst_43 {dimension_numbers = #tpu.dot_dimension_numbers<[1], [0], [0], [1], [0, 0, 1, 1], [], []>} : vector<16x32xf32>, vector<32x32xf32>, vector<16x32xf32> -> vector<16x32xf32>
    %74 = arith.addf %72, %73 : vector<16x32xf32>
    %75 = arith.addf %74, %70 : vector<16x32xf32>
    %cst_44 = arith.constant 0.000000e+00 : f32
    %76 = vector.broadcast %cst_44 : f32 to vector<16x32xf32>
    %77 = arith.maximumf %75, %76 : vector<16x32xf32>
    %c0_45 = arith.constant 0 : index
    %c0_46 = arith.constant 0 : index
    %78 = vector.load %arg3[%c0_45, %c0_46] : memref<16x32xf32, #tpu.memory_space<vmem>>, vector<16x32xf32>
    tpu.vector_store %arg3[%c0_45, %c0_46], %77 {strides = array<i32>} : memref<16x32xf32, #tpu.memory_space<vmem>>, vector<16x32xf32>,
    return
  }
}

</mosaic_0001>

<bundles_post_ra>
// kernel: processor_forward.1
= control target key start
LH: loop header
LB: loop body
LE: loop exit
PB: predicated region body
PF: predicated region fallthrough
CT: control target
= control target key end

     0   :  { %v17_v1 = vlaneseq  ;;  %s1705_s0 = inlined_call_operand.vmem [shape: f32[3,48], index: 0, kind: input, shape index: {}]   ;;  %s1706_s1 = inlined_call_operand.vmem [shape: f32[16,32], index: 1, kind: input, shape index: {}]   ;;  %s1707_s2 = inlined_call_operand.vmem [shape: f32[3,65,32], index: 2, kind: input, shape index: {}]   ;;  %s1708_s3 = inlined_call_operand.hbm [shape: f32[16,32], index: 3, kind: output, shape index: {}]  }
   0x1   :  { %v15_v0 = vld [vmem:[%s1705_s0] sm:$0x7]  ;;  %v131_v3 = vld [vmem:[%s1706_s1 + $0x8] sm:$0xff] }
   0x2   :  { %v130_v2 = vld [vmem:[%s1706_s1] sm:$0xff]  ;;  %v1507_v4 = vtrunc.f32 %v15_v0  ;;  %v18_v6 = vshrl.u32 %v17_v1, 7 }
   0x3   :  { %v1419_v5 = vpack.c.bf16 %v131_v3, %v130_v2 }
   0x4   :  { %8 = vsyncpa [#allocation3], 0  ;;  %v1508_v7 = vcvt.f32.s32 %v1507_v4  ;;  %v19_v8 = vadd.s32 8, %v18_v6  ;;  %v32_v9 = vsub.s32 0, %v18_v6  ;;  %v38_v10 = vsub.s32 2, %v18_v6  ;;  %v136_v21 = vld [vmem:[%s1707_s2 + $0x20] sm:$0xff] }
   0x5   :  { %1420 = vmatprep.subr.bf16.mxu1 %v1419_v5  ;;  %v22_v11 = vsub.s32 1, %v18_v6  ;;  %vm42_vm0 = vcmask 392192   ;;  %v1537_v17 = vmov 0.0   ;;  %v137_v22 = vld [vmem:[%s1707_s2 + $0x28] sm:$0xff]  ;;  %v138_v24 = vld [vmem:[%s1707_s2 + $0x30] sm:$0xff]  ;;  %v139_v25 = vld [vmem:[%s1707_s2 + $0x38] sm:$0xff] }
   0x6   :  { %1422 = vmatpush3.bf16.msra.mxu1 %v1419_v5  ;;  %v33_v12 = vrot.slane %v1508_v7, %v32_v9  ;;  %v39_v13 = vrot.slane %v15_v0, %v38_v10  ;;  %vm1414_vm4 = vmpackc.low %vm42_vm0, %vm42_vm0  ;;  %v1423_v23 = vpack.c.bf16 %v137_v22, %v136_v21  ;;  %vm145_vm6 = vcmask 130048   ;;  %v132_v29 = vld [vmem:[%s1707_s2] sm:$0xff]  ;;  %v133_v30 = vld [vmem:[%s1707_s2 + $0x8] sm:$0xff]  ;;  %s1538_s14 = smov [#allocation2]  }
   0x7   :  { %v23_v14 = vrot.slane %v1508_v7, %v22_v11  ;;  %v1427_v28 = vpack.c.bf16 %v139_v25, %v138_v24  ;;  %vm227_vm7 = vcmask 261120   ;;  %v1431_v31 = vpack.c.bf16 %v133_v30, %v132_v29  ;;  %v134_v32 = vld [vmem:[%s1707_s2 + $0x10] sm:$0xff]  ;;  %v135_v33 = vld [vmem:[%s1707_s2 + $0x18] sm:$0xff]  ;;  %v1188_v35 = vld [vmem:[%s1707_s2 + $0x68] sm:$0xff]  ;;  %s1160_s15 = sshll.u32 %s1538_s14, 4  ;;  %s1161_s15 = int_to_ptr.vmem [resolvable:$true] %s1160_s15 }
   0x8   :  { %vm34_vm1 = vcmp.eq.s32.totalorder %v18_v6, %v33_v12  ;;  %vm35_vm2 = vcmp.eq.s32.totalorder %v19_v8, %v33_v12  ;;  %1424 = vmatprep.subr.bf16.mxu1 %v1423_v23  ;;  %v1435_v34 = vpack.c.bf16 %v135_v33, %v134_v32  ;;  %v1189_v36 = vld [vmem:[%s1707_s2 + $0x70] sm:$0xff]  ;;  %v1190_v40 = vld [vmem:[%s1707_s2 + $0x78] sm:$0xff]  ;;  %v1191_v41 = vld [vmem:[%s1707_s2 + $0x80] sm:$0xff]  ;;  %s1513_s16 = scalar_lea.vmem %s1161_s15, 256  ;;  %p1518_p1 = scmp.lt.s32.totalorder %s1161_s15, %s1161_s15 }
   0x9   :  { %vm24_vm3 = vcmp.eq.s32.totalorder %v18_v6, %v23_v14  ;;  %v40_v15 = vsel %vm34_vm1, %v39_v13, 0.0  ;;  %v41_v16 = vsel %vm35_vm2, %v39_v13, 0.0  ;;  %vm25_vm5 = vcmp.eq.s32.totalorder %v19_v8, %v23_v14  ;;  %v1184_v43 = vld [vmem:[%s1707_s2 + $0x48] sm:$0xff]  ;;  %v1185_v44 = vld [vmem:[%s1707_s2 + $0x50] sm:$0xff]  ;;  %v1177_v46 = vld [vmem:[%s1707_s2 + $0x40] ss:$0 sm:$0xff]  ;;  %p1514_p0 = scmp.ne.s32.totalorder %s1161_s15, %s1513_s16  ;;  %p1519_p2 = scmp.lt.s32.totalorder %s1513_s16, %s1513_s16 }
   0xa   :  { %v1171_v18 = vsel %vm24_vm3, 1.0, %v1537_v17  ;;  %v1413_v19 = vpack.c.bf16 %v41_v16, %v40_v15  ;;  %v1172_v20 = vsel %vm25_vm5, 1.0, %v1537_v17  ;;  %v1443_v37 = vpack.c.bf16 %v1189_v36, %v1188_v35  ;;  %v1186_v51 = vld [vmem:[%s1707_s2 + $0x58] sm:$0xff]  ;;  %v1187_v52 = vld [vmem:[%s1707_s2 + $0x60] sm:$0xff]  ;;  %v1193_v59 = vld [vmem:[%s1707_s2 + $0x88] ss:$0 sm:$0xff] }
   0xb   :  { %1294 = vmatprep.mubr.msk.f32.mxu0 %vm42_vm0, %v1171_v18  ;;  %v1447_v42 = vpack.c.bf16 %v1191_v41, %v1190_v40  ;;  %v1451_v45 = vpack.c.bf16 %v1185_v44, %v1184_v43  ;;  %v1455_v55 = vpack.c.bf16 %v1187_v52, %v1186_v51  ;;  %v1210_v18 = vld [vmem:[%s1707_s2 + $0xb0] sm:$0xff]  ;;  %v1213_v24 = vld [vmem:[%s1707_s2 + $0xc8] sm:$0xff]  ;;  %v1208_v30 = vld [vmem:[%s1707_s2 + $0xa0] sm:$0xff]  ;;  %p1520_p3 = por %p1519_p2, %p1518_p1 }
   0xc   :  { %1415 = vmatprep.subr.msk.bf16.mxu0 %vm1414_vm4, %v1413_v19 }
   0xd   :  { %1418 = vmatpush3.bf16.xpose.msk.msra.mxu0 %vm1414_vm4, %v1413_v19  ;;  %v1211_v19 = vld [vmem:[%s1707_s2 + $0xb8] sm:$0xff]  ;;  %p1521_p4 = pnand %p1520_p3, %p1514_p0 }
   0xe   :  { %1444 = vmatprep.subr.bf16.mxu0 %v1443_v37  ;;  %v1483_v22 = vpack.c.bf16 %v1211_v19, %v1210_v18 }
  0x14   :  { %1295 = vmatmul.mubr.msk.f32.vlgmr.msra.gmra.mrb[0].mxu0 %vm42_vm0, %v1172_v20 }
  0x15   :  { %1446 = vmatpush3.bf16.msra.mxu0 %v1443_v37 }
  0x16   :  { %1448 = vmatprep.subr.bf16.mxu0 %v1447_v42 }
  0x19   :  { %1450 = vmatpush3.bf16.msra.mxu0 %v1447_v42 }
  0x1a   :  { %1452 = vmatprep.subr.bf16.mxu0 %v1451_v45 }
  0xe7   :  { %v1586_v26 = vpop.f32.mrb[0].mxu0 }
  0xe8   :  { %v1588_v27 = vpop.f32.mrb[1].mxu0 }
  0xe9   :  { %1301 = vmatprep.mubr.msk.f32.mxu1 %vm145_vm6, %v1588_v27 }
  0xea   :  { %1302 = vmatmul.mubr.msk.f32.vlgmr.msra.gmra.mrb[0].mxu1 %vm145_vm6, %v1586_v26 }
  0xeb   :  { %1426 = vmatpush3.bf16.msra.mxu1 %v1423_v23  ;;  %1312 = vmatprep.mubr.msk.f32.mxu1 %vm227_vm7, %v130_v2  ;;  %v1212_v23 = vld [vmem:[%s1707_s2 + $0xc0] sm:$0xff] }
  0xec   :  { %1428 = vmatprep.subr.bf16.mxu1 %v1427_v28  ;;  %v1487_v25 = vpack.c.bf16 %v1213_v24, %v1212_v23 }
  0xef   :  { %1430 = vmatpush3.bf16.msra.mxu1 %v1427_v28  ;;  %v1207_v28 = vld [vmem:[%s1707_s2 + $0x98] sm:$0xff] }
  0xf0   :  { %1432 = vmatprep.subr.bf16.mxu1 %v1431_v31 }
  0xf2   :  { %1313 = vmatmul.mubr.msk.f32.vlgmr.msra.gmra.mrb[2].mxu1 %vm227_vm7, %v131_v3 }
  0xf3   :  { %1434 = vmatpush3.bf16.msra.mxu1 %v1431_v31  ;;  %v1209_v31 = vld [vmem:[%s1707_s2 + $0xa8] sm:$0xff] }
  0xf4   :  { %1436 = vmatprep.subr.bf16.mxu1 %v1435_v34  ;;  %v1495_v32 = vpack.c.bf16 %v1209_v31, %v1208_v30 }
  0xf7   :  { %1438 = vmatpush3.bf16.msra.mxu1 %v1435_v34  ;;  %v1215_v34 = vld [vmem:[%s1707_s2 + $0xd0] ss:$0 sm:$0xff] }
 0x1bd   :  { %v1303_v38 = vpop.f32.mrb[0].mxu1 }
 0x1be   :  { %v218_v39 = vpop.f32.mrb[1].mxu1 }
 0x1bf   :  { %1323 = vmatprep.mubr.msk.f32.mxu1 %vm227_vm7, %v218_v39 }
 0x1c0   :  { %1324 = vmatmul.mubr.msk.f32.vlgmr.msra.gmra.mrb[2].mxu1 %vm227_vm7, %v1303_v38 }
 0x1c1   :  { %1330 = vmatprep.mubr.msk.f32.mxu1 %vm145_vm6, %v1588_v27 }
 0x293   :  { %v1325_v47 = vpop.f32.mrb[2].mxu1 }
 0x294   :  { %v391_v48 = vadd.f32 %v1325_v47, %v1177_v46  ;;  %v381_v49 = vpop.f32.mrb[3].mxu1 }
 0x295   :  { %v390_v50 = vadd.f32 %v1177_v46, %v381_v49 }
 0x296   :  { %v393_v53 = vmax.f32 %v391_v48, 0.0 }
 0x297   :  { %v392_v54 = vmax.f32 %v390_v50, 0.0 }
 0x299   :  { %1341 = vmatprep.mubr.msk.f32.mxu0 %vm227_vm7, %v392_v54  ;;  %v1439_v56 = vpack.c.bf16 %v393_v53, %v392_v54 }
 0x29a   :  { %1342 = vmatmul.mubr.msk.f32.vlgmr.msra.gmra.mrb[2].mxu0 %vm227_vm7, %v393_v53 }
 0x29b   :  { %1440 = vmatprep.subr.bf16.mxu1 %v1439_v56  ;;  %1454 = vmatpush3.bf16.msra.mxu0 %v1451_v45 }
 0x29c   :  { %1442 = vmatpush3.bf16.msra.mxu1 %v1439_v56  ;;  %1456 = vmatprep.subr.bf16.mxu0 %v1455_v55 }
 0x29f   :  { %1331 = vmatmul.mubr.msk.f32.vlgmr.msra.gmra.mrb[4].mxu1 %vm145_vm6, %v1586_v26  ;;  %1458 = vmatpush3.bf16.msra.mxu0 %v1455_v55 }
 0x2a0   :  { %1359 = vmatprep.mubr.msk.f32.mxu1 %vm145_vm6, %v1588_v27 }
 0x372   :  { %v1332_v57 = vpop.f32.mrb[4].mxu1 }
 0x373   :  { %v474_v58 = vpop.f32.mrb[5].mxu1 }
 0x374   :  { %1352 = vmatprep.mubr.msk.f32.mxu0 %vm227_vm7, %v474_v58 }
 0x375   :  { %1353 = vmatmul.mubr.msk.f32.vlgmr.msra.gmra.mrb[2].mxu0 %vm227_vm7, %v1332_v57 }
 0x376   :  { %1388 = vmatprep.mubr.msk.f32.mxu0 %vm145_vm6, %v1588_v27  ;;  %v1206_v27 = vld [vmem:[%s1707_s2 + $0x90] sm:$0xff] }
 0x377   :  { %v1491_v29 = vpack.c.bf16 %v1207_v28, %v1206_v27 }
 0x448   :  { %v1354_v60 = vpop.f32.mrb[2].mxu0 }
 0x449   :  { %v646_v61 = vadd.f32 %v1354_v60, %v1193_v59  ;;  %v636_v62 = vpop.f32.mrb[3].mxu0 }
 0x44a   :  { %v645_v63 = vadd.f32 %v1193_v59, %v636_v62 }
 0x44b   :  { %v648_v0 = vmax.f32 %v646_v61, 0.0 }
 0x44c   :  { %v647_v1 = vmax.f32 %v645_v63, 0.0 }
 0x44d   :  { %v650_v2 = vadd.f32 %v648_v0, %v393_v53 }
 0x44e   :  { %v649_v3 = vadd.f32 %v647_v1, %v392_v54 }
 0x44f   :  { %v652_v4 = vmax.f32 %v650_v2, 0.0 }
 0x450   :  { %v651_v5 = vmax.f32 %v649_v3, 0.0 }
 0x452   :  { %v1459_v6 = vpack.c.bf16 %v652_v4, %v651_v5 }
 0x454   :  { %1460 = vmatprep.subr.bf16.mxu1 %v1459_v6 }
 0x455   :  { %1462 = vmatpush3.bf16.msra.mxu1 %v1459_v6 }
 0x456   :  { %1464 = vmatprep.subr.bf16.mxu1 %v1443_v37 }
 0x458   :  { %1360 = vmatmul.mubr.msk.f32.vlgmr.msra.gmra.mrb[6].mxu1 %vm145_vm6, %v1586_v26 }
 0x459   :  { %1466 = vmatpush3.bf16.msra.mxu1 %v1443_v37  ;;  %1370 = vmatprep.mubr.msk.f32.mxu1 %vm227_vm7, %v651_v5 }
 0x45a   :  { %1468 = vmatprep.subr.bf16.mxu1 %v1447_v42 }
 0x45d   :  { %1470 = vmatpush3.bf16.msra.mxu1 %v1447_v42 }
 0x45e   :  { %1472 = vmatprep.subr.bf16.mxu1 %v1451_v45 }
 0x460   :  { %1371 = vmatmul.mubr.msk.f32.vlgmr.msra.gmra.mrb[8].mxu1 %vm227_vm7, %v652_v4 }
 0x461   :  { %1474 = vmatpush3.bf16.msra.mxu1 %v1451_v45 }
 0x462   :  { %1476 = vmatprep.subr.bf16.mxu1 %v1455_v55 }
 0x465   :  { %1478 = vmatpush3.bf16.msra.mxu1 %v1455_v55 }
 0x52b   :  { %v1361_v7 = vpop.f32.mrb[6].mxu1 }
 0x52c   :  { %v719_v8 = vpop.f32.mrb[7].mxu1 }
 0x52d   :  { %1381 = vmatprep.mubr.msk.f32.mxu1 %vm227_vm7, %v719_v8 }
 0x52e   :  { %1382 = vmatmul.mubr.msk.f32.vlgmr.msra.gmra.mrb[8].mxu1 %vm227_vm7, %v1361_v7 }
 0x601   :  { %v1383_v9 = vpop.f32.mrb[8].mxu1 }
 0x602   :  { %v891_v10 = vadd.f32 %v1383_v9, %v1193_v59  ;;  %v881_v11 = vpop.f32.mrb[9].mxu1 }
 0x603   :  { %v890_v12 = vadd.f32 %v1193_v59, %v881_v11 }
 0x604   :  { %v893_v13 = vmax.f32 %v891_v10, 0.0 }
 0x605   :  { %v892_v14 = vmax.f32 %v890_v12, 0.0 }
 0x606   :  { %v895_v15 = vadd.f32 %v893_v13, %v652_v4 }
 0x607   :  { %v894_v16 = vadd.f32 %v892_v14, %v651_v5 }
 0x608   :  { %v897_v17 = vmax.f32 %v895_v15, 0.0 }
 0x609   :  { %v896_v20 = vmax.f32 %v894_v16, 0.0 }
 0x60b   :  { %v1479_v21 = vpack.c.bf16 %v897_v17, %v896_v20 }
 0x60d   :  { %1480 = vmatprep.subr.bf16.mxu0 %v1479_v21 }
 0x60e   :  { %1482 = vmatpush3.bf16.msra.mxu0 %v1479_v21 }
 0x60f   :  { %1484 = vmatprep.subr.bf16.mxu0 %v1483_v22 }
 0x611   :  { %1389 = vmatmul.mubr.msk.f32.vlgmr.msra.gmra.mrb[4].mxu0 %vm145_vm6, %v1586_v26 }
 0x612   :  { %1486 = vmatpush3.bf16.msra.mxu0 %v1483_v22  ;;  %1399 = vmatprep.mubr.msk.f32.mxu0 %vm227_vm7, %v896_v20 }
 0x613   :  { %1488 = vmatprep.subr.bf16.mxu0 %v1487_v25 }
 0x616   :  { %1490 = vmatpush3.bf16.msra.mxu0 %v1487_v25 }
 0x617   :  { %1492 = vmatprep.subr.bf16.mxu0 %v1491_v29 }
 0x619   :  { %1400 = vmatmul.mubr.msk.f32.vlgmr.msra.gmra.mrb[6].mxu0 %vm227_vm7, %v897_v17 }
 0x61a   :  { %1494 = vmatpush3.bf16.msra.mxu0 %v1491_v29 }
 0x61b   :  { %1496 = vmatprep.subr.bf16.mxu0 %v1495_v32 }
 0x61e   :  { %1498 = vmatpush3.bf16.msra.mxu0 %v1495_v32 }
 0x6e4   :  { %v1390_v26 = vpop.f32.mrb[4].mxu0 }
 0x6e5   :  { %v978_v33 = vpop.f32.mrb[5].mxu0 }
 0x6e6   :  { %1410 = vmatprep.mubr.msk.f32.mxu0 %vm227_vm7, %v978_v33 }
 0x6e7   :  { %1411 = vmatmul.mubr.msk.f32.vlgmr.msra.gmra.mrb[6].mxu0 %vm227_vm7, %v1390_v26 }
 0x7ba   :  { %v1412_v35 = vpop.f32.mrb[6].mxu0 }
 0x7bb   :  { %v1150_v36 = vadd.f32 %v1412_v35, %v1215_v34  ;;  %v1140_v37 = vpop.f32.mrb[7].mxu0 }
 0x7bc   :  { %v1149_v38 = vadd.f32 %v1215_v34, %v1140_v37 }
 0x7bd   :  { %v1152_v39 = vmax.f32 %v1150_v36, 0.0 }
 0x7be   :  { %v1151_v40 = vmax.f32 %v1149_v38, 0.0 }
 0x7bf   :  { %1154 = vst.msk [vmem:[#allocation2 + $0x8] sm:$0xff] %vm227_vm7, %v1152_v39 }
 0x7c0   :  { %1153 = vst.msk [vmem:[#allocation2] sm:$0xff] %vm227_vm7, %v1151_v40 }
 0x7c1   :  { %1524 = shalt.err (!%p1521_p4)
}
 0x7c2   :  { %s1525_s0 = scalar_lea.hbm %s1708_s3, 256 }
 0x7c3   :  { %p1526_p5 = scmp.ne.s32.totalorder %s1708_s3, %s1525_s0  ;;  %p1529_p6 = scmp.lt.u32.totalorder %s1525_s0, %s1708_s3 }
 0x7c5   :  { %p1531_p7 = pnand %p1529_p6, %p1526_p5 }
 0x7c7   :  { %1534 = shalt.err (!%p1531_p7)
}
 0x7c8   :  { %s1539_s21 = smov 128   ;;  %s1540_s22 = smov 8  }
 0x7c9   :  { %1166 = dma.vmem_to_hbm [thread:$0]  %s1161_s15, 256, %s1708_s3, [#allocation3], %s1539_s21, %s1539_s21, %s1540_s22  }
 0x7ca   :  { %1535 = dma.done.wait [#allocation3], 256  }
 0x7cb   :  { %1536 = vsyncadd [#allocation3], 4294967040 }
 0x7cc   :  { %1170 = vsyncpa [#allocation3], 1 }

</bundles_post_ra>
